<compile_context>
chip_gen: v7x
topology: tpu7x:2x2x1
jax: 0.10.0
libtpu: 0.0.40
codegen_flags: <defaults>
</compile_context>

<pallas_src>
import functools

import jax
import jax.numpy as jnp
from jax.experimental import pallas as pl
from jax.experimental.pallas import tpu as pltpu


_LANE = 512  # lane-dense last dim (multiple of 128)


def _round_up(x, m):
    return ((x + m - 1) // m) * m


def _sublane_align(dtype):
    """Minimum sublane multiple for a dtype (8 for f32, 16 for bf16, 32 for 8-bit)."""
    itemsize = jnp.dtype(dtype).itemsize
    if itemsize >= 4:
        return 8
    if itemsize == 2:
        return 16
    return 32


@functools.lru_cache(maxsize=1)
def _select_tiling():
    """Generation-dependent (max row tile, vmem_limit_bytes)."""
    # v7x-safe defaults: 64 MiB VMEM/TC -> 3072*512*4B = 6 MiB / stream / buffer,
    # 3 streams x 2 buffers = 36 MiB under a 48 MiB scoped limit.
    tr_max, vmem_limit = 3072, 48 << 20
    vmem_cap = None
    try:
        vmem_cap = pltpu.get_tpu_info().vmem_capacity_bytes
    except Exception:  # pragma: no cover - fall back to conservative defaults
        pass
    kind = ""
    try:
        kind = jax.devices()[0].device_kind.lower()
    except Exception:  # pragma: no cover
        pass
    if vmem_cap is not None and vmem_cap >= (100 << 20):
        # 128 MiB VMEM parts (v5e / v6e).
        if "v5" in kind:
            # v5e: HBM is slow enough that per-step overhead is already <3%;
            # keep the smaller tiles, just raise the 16 MiB default scoped VMEM.
            tr_max, vmem_limit = 2048, 40 << 20
        else:
            # v6e: plenty of VMEM, halve the grid-step count.
            tr_max, vmem_limit = 4096, 64 << 20
    return tr_max, vmem_limit


def _mixer_kernel(alpha_ref, a_ref, b_ref, o_ref):
    a = a_ref[...]
    b = b_ref[...]
    alpha = alpha_ref[0]  # f32 scalar from SMEM, already sigmoid(raw_alpha)
    if a.dtype != jnp.float32:
        # Keep sub-32-bit streams packed instead of promoting every vreg to f32.
        alpha = alpha.astype(a.dtype)
    # b + alpha * (a - b)  ==  alpha*a + (1-alpha)*b
    o_ref[...] = (b + (a - b) * alpha).astype(o_ref.dtype)


def _mix_slab(alpha_sig, a_flat, b_flat, out_dtype):
    """Mix a LANE-aligned 1-D slab through the Pallas kernel. Returns 1-D."""
    n = a_flat.shape[0]  # multiple of _LANE
    rows = n // _LANE
    a2 = a_flat.reshape(rows, _LANE)
    b2 = b_flat.reshape(rows, _LANE)

    tr_max, vmem_limit = _select_tiling()
    ralign = _sublane_align(out_dtype)

    # Row tile: as large as VMEM allows, but aim for >= 2 grid steps whenever
    # possible so the "parallel" axis shards across both v7x TensorCores.
    if rows <= ralign:
        tr = rows  # block equals the full array dim (allowed by the tiling rule)
    else:
        tr = min(tr_max, _round_up(-(-rows // 2), ralign))
        if tr >= rows:
            tr = rows
    grid_n = -(-rows // tr)  # cdiv; last block may be partial (Pallas masks it)

    itemsize = jnp.dtype(out_dtype).itemsize
    cost = pl.CostEstimate(
        flops=3 * n,                       # sub + mul + add per element
        transcendentals=0,
        bytes_accessed=3 * n * itemsize,   # 2 reads + 1 write
    )

    out2d = pl.pallas_call(
        _mixer_kernel,
        out_shape=jax.ShapeDtypeStruct((rows, _LANE), out_dtype),
        grid_spec=pl.GridSpec(
            grid=(grid_n,),
            in_specs=[
                pl.BlockSpec(memory_space=pltpu.MemorySpace.SMEM),  # alpha scalar
                pl.BlockSpec((tr, _LANE), lambda i: (i, 0)),        # attn0 tile
                pl.BlockSpec((tr, _LANE), lambda i: (i, 0)),        # attn1 tile
            ],
            out_specs=pl.BlockSpec((tr, _LANE), lambda i: (i, 0)),
        ),
        compiler_params=pltpu.CompilerParams(
            dimension_semantics=("parallel",),   # shard row tiles across TCs
            vmem_limit_bytes=vmem_limit,
        ),
        cost_estimate=cost,
    )(alpha_sig, a2, b2)

    return out2d.reshape(-1)


def _mix_xla(alpha_sig, a, b, out_dtype):
    """Plain-XLA mix (used only for the tiny sub-LANE tail)."""
    alpha = alpha_sig[0]
    if jnp.dtype(out_dtype) != jnp.dtype(jnp.float32):
        alpha = alpha.astype(out_dtype)
    return (b + (a - b) * alpha).astype(out_dtype)


def attention_mixer(raw_alpha, attn0, attn1):
    """Pallas implementation of AttentionMixer.forward(attn0, attn1)."""
    if attn0.shape != attn1.shape:
        raise ValueError("AttentionMixer requires two attention maps of identical shape.")
    orig_shape = attn0.shape
    out_dtype = jnp.result_type(attn0.dtype, attn1.dtype)

    n = 1
    for d in orig_shape:
        n *= d
    if n == 0:
        return jnp.zeros(orig_shape, out_dtype)

    # sigmoid computed once on the host/XLA side, passed as an SMEM f32 scalar.
    alpha_sig = jax.nn.sigmoid(jnp.asarray(raw_alpha, dtype=jnp.float32)).reshape(1)

    a_flat = attn0.astype(out_dtype).reshape(-1)
    b_flat = attn1.astype(out_dtype).reshape(-1)

    n_main = (n // _LANE) * _LANE
    if n_main == 0:
        # Entire input is smaller than one lane row -> kernel launch not worth it.
        return _mix_xla(alpha_sig, a_flat, b_flat, out_dtype).reshape(orig_shape)

    main = _mix_slab(alpha_sig, a_flat[:n_main], b_flat[:n_main], out_dtype)
    if n_main == n:
        return main.reshape(orig_shape)

    # Unaligned tail (< _LANE elements): mix in XLA instead of padding/copying
    # the whole arrays.
    tail = _mix_xla(alpha_sig, a_flat[n_main:], b_flat[n_main:], out_dtype)
    return jnp.concatenate([main, tail]).reshape(orig_shape)


def _reference(raw_alpha, attn0, attn1):
    alpha = jax.nn.sigmoid(jnp.asarray(raw_alpha, dtype=jnp.float32))
    return alpha * attn0.astype(jnp.float32) + (1.0 - alpha) * attn1.astype(jnp.float32)


if __name__ == "__main__":
    key = jax.random.PRNGKey(0)
    raw_alpha = jnp.float32(0.0)  # matches nn.Parameter(torch.tensor(0.0))

    # 1) canonical attention-map shape [B, H, L, L] (LANE-aligned, single block)
    k0, k1, key = (*jax.random.split(key, 2), key)
    B, H, L = 2, 4, 16
    a = jax.random.uniform(k0, (B, H, L, L), dtype=jnp.float32)
    b = jax.random.uniform(k1, (B, H, L, L), dtype=jnp.float32)
    out = jax.block_until_ready(attention_mixer(raw_alpha, a, b))
    assert out.shape == a.shape and out.dtype == a.dtype
    assert jnp.allclose(out, _reference(raw_alpha, a, b), atol=1e-6, rtol=1e-6)

    # 2) larger aligned case -> >= 2 grid steps (both v7x TCs stream)
    k0, k1, key = (*jax.random.split(key, 2), key)
    a = jax.random.uniform(k0, (2, 4, 32, 32), dtype=jnp.float32)
    b = jax.random.uniform(k1, (2, 4, 32, 32), dtype=jnp.float32)
    out = jax.block_until_ready(attention_mixer(raw_alpha, a, b))
    assert jnp.allclose(out, _reference(raw_alpha, a, b), atol=1e-6, rtol=1e-6)

    # 3) unaligned case -> kernel on the aligned prefix + XLA tail (no full pad)
    k0, k1, key = (*jax.random.split(key, 2), key)
    a = jax.random.uniform(k0, (2, 4, 16, 17), dtype=jnp.float32)
    b = jax.random.uniform(k1, (2, 4, 16, 17), dtype=jnp.float32)
    out = jax.block_until_ready(attention_mixer(raw_alpha, a, b))
    assert jnp.allclose(out, _reference(raw_alpha, a, b), atol=1e-6, rtol=1e-6)

    # 4) tiny (< 512 element) case -> pure XLA fallback path
    k0, k1, key = (*jax.random.split(key, 2), key)
    a = jax.random.uniform(k0, (2, 3, 5, 7), dtype=jnp.float32)
    b = jax.random.uniform(k1, (2, 3, 5, 7), dtype=jnp.float32)
    out = jax.block_until_ready(attention_mixer(raw_alpha, a, b))
    assert jnp.allclose(out, _reference(raw_alpha, a, b), atol=1e-6, rtol=1e-6)

    # 5) bf16 inputs -> packed-dtype mix path
    k0, k1, key = (*jax.random.split(key, 2), key)
    a = jax.random.uniform(k0, (2, 4, 32, 32), dtype=jnp.float32).astype(jnp.bfloat16)
    b = jax.random.uniform(k1, (2, 4, 32, 32), dtype=jnp.float32).astype(jnp.bfloat16)
    out = jax.block_until_ready(attention_mixer(raw_alpha, a, b))
    assert out.dtype == jnp.bfloat16
    assert jnp.allclose(out.astype(jnp.float32), _reference(raw_alpha, a, b), atol=2e-2)

    print("KERNEL_OK")
</pallas_src>

<mosaic_0001>
module attributes {stable_mosaic.version = 11 : i64} {
  func.func @_mixer_kernel(%arg0: i32, %arg1: memref<1xf32, #tpu.memory_space<smem>>, %arg2: memref<4x512xf32, #tpu.memory_space<vmem>>, %arg3: memref<4x512xf32, #tpu.memory_space<vmem>>, %arg4: memref<4x512xf32, #tpu.memory_space<vmem>>) attributes {dimension_semantics = [#tpu.dimension_semantics<parallel>], iteration_bounds = array<i64: 1>, scalar_prefetch = 0 : i64, scratch_operands = 0 : i64, tpu.core_type = #tpu.core_type<tc>, window_params = [{transform_indices = @transform_0, window_bounds = array<i64: 1>}, {transform_indices = @transform_1, window_bounds = array<i64: 4, 512>}, {transform_indices = @transform_2, window_bounds = array<i64: 4, 512>}, {transform_indices = @transform_3, window_bounds = array<i64: 4, 512>}]} {
    %c0 = arith.constant 0 : index
    %c0_0 = arith.constant 0 : index
    %0 = vector.load %arg2[%c0, %c0_0] : memref<4x512xf32, #tpu.memory_space<vmem>>, vector<4x512xf32>
    %c0_1 = arith.constant 0 : index
    %c0_2 = arith.constant 0 : index
    %1 = vector.load %arg3[%c0_1, %c0_2] : memref<4x512xf32, #tpu.memory_space<vmem>>, vector<4x512xf32>
    %c0_3 = arith.constant 0 : index
    %2 = memref.load %arg1[%c0_3] : memref<1xf32, #tpu.memory_space<smem>>
    %3 = arith.subf %0, %1 : vector<4x512xf32>
    %4 = vector.broadcast %2 : f32 to vector<4x512xf32>
    %5 = arith.mulf %3, %4 : vector<4x512xf32>
    %6 = arith.addf %1, %5 : vector<4x512xf32>
    %c0_4 = arith.constant 0 : index
    %c0_5 = arith.constant 0 : index
    %7 = vector.load %arg4[%c0_4, %c0_5] : memref<4x512xf32, #tpu.memory_space<vmem>>, vector<4x512xf32>
    tpu.vector_store %arg4[%c0_4, %c0_5], %6 {strides = array<i32>} : memref<4x512xf32, #tpu.memory_space<vmem>>, vector<4x512xf32>,
    return
  }
  func.func @transform_0(%arg0: i32) -> i32 {
    %c0_i32 = arith.constant 0 : i32
    %c0_i32_0 = arith.constant 0 : i32
    return %c0_i32 : i32
  }
  func.func @transform_1(%arg0: i32) -> (i32, i32) {
    %c0_i32 = arith.constant 0 : i32
    %c0_i32_0 = arith.constant 0 : i32
    return %arg0, %c0_i32 : i32, i32
  }
  func.func @transform_2(%arg0: i32) -> (i32, i32) {
    %c0_i32 = arith.constant 0 : i32
    %c0_i32_0 = arith.constant 0 : i32
    return %arg0, %c0_i32 : i32, i32
  }
  func.func @transform_3(%arg0: i32) -> (i32, i32) {
    %c0_i32 = arith.constant 0 : i32
    %c0_i32_0 = arith.constant 0 : i32
    return %arg0, %c0_i32 : i32, i32
  }
}

</mosaic_0001>

<bundles_post_ra>
// kernel: tpu_custom_call.1
= control target key start
LH: loop header
LB: loop body
LE: loop exit
PB: predicated region body
PF: predicated region fallthrough
CT: control target
= control target key end

     0   :  { %9 = vsyncpa [#allocation4], 0  ;;  %s207_s0 = inlined_call_operand.<no memory space> [shape: f32[1], index: 0, kind: input, shape index: {}]   ;;  %s208_s1 = inlined_call_operand.hbm [shape: f32[4,512], index: 1, kind: input, shape index: {}]   ;;  %s209_s2 = inlined_call_operand.hbm [shape: f32[4,512], index: 2, kind: input, shape index: {}]   ;;  %s210_s3 = inlined_call_operand.hbm [shape: f32[4,512], index: 3, kind: output, shape index: {}]  }
   0x1   :  { %10 = vsyncpa [#allocation7], 0 }
   0x2   :  { %11 = vsyncpa [#allocation5], 0  ;;  %s145_s12 = smov [#allocation3]   ;;  %s146_s14 = smov [#allocation6]  }
   0x3   :  { %s20_s13 = sshll.u32 %s145_s12, 4  ;;  %s30_s15 = sshll.u32 %s146_s14, 4  ;;  %s21_s13 = int_to_ptr.vmem [resolvable:$true] %s20_s13  ;;  %s31_s15 = int_to_ptr.vmem [resolvable:$true] %s30_s15 }
   0x4   :  { %s73_s18 = scalar_lea.hbm %s208_s1, 256 }
   0x5   :  { %p74_p0 = scmp.ne.s32.totalorder %s208_s1, %s73_s18  ;;  %p77_p1 = scmp.lt.u32.totalorder %s73_s18, %s208_s1 }
   0x7   :  { %p79_p2 = pnand %p77_p1, %p74_p0 }
   0x9   :  { %82 = shalt.err (!%p79_p2)
}
   0xa   :  { %s83_s23 = scalar_lea.vmem %s21_s13, 256  ;;  %p88_p4 = scmp.lt.s32.totalorder %s21_s13, %s21_s13 }
   0xb   :  { %p84_p3 = scmp.ne.s32.totalorder %s21_s13, %s83_s23  ;;  %p89_p5 = scmp.lt.s32.totalorder %s83_s23, %s83_s23 }
   0xd   :  { %p90_p6 = por %p89_p5, %p88_p4 }
   0xf   :  { %p91_p7 = pnand %p90_p6, %p84_p3 }
  0x11   :  { %94 = shalt.err (!%p91_p7)
}
  0x12   :  { %23 = dma.hbm_to_vmem [thread:$0]  %s208_s1, 256, %s21_s13, [#allocation4]  }
  0x13   :  { %s95_s28 = scalar_lea.hbm %s209_s2, 256 }
  0x14   :  { %p96_p8 = scmp.ne.s32.totalorder %s209_s2, %s95_s28  ;;  %p99_p9 = scmp.lt.u32.totalorder %s95_s28, %s209_s2 }
  0x16   :  { %p101_p10 = pnand %p99_p9, %p96_p8 }
  0x18   :  { %104 = shalt.err (!%p101_p10)
}
  0x19   :  { %s105_s6 = scalar_lea.vmem %s31_s15, 256  ;;  %p110_p12 = scmp.lt.s32.totalorder %s31_s15, %s31_s15 }
  0x1a   :  { %p106_p11 = scmp.ne.s32.totalorder %s31_s15, %s105_s6  ;;  %p111_p13 = scmp.lt.s32.totalorder %s105_s6, %s105_s6 }
  0x1c   :  { %p112_p0 = por %p111_p13, %p110_p12 }
  0x1e   :  { %p113_p1 = pnand %p112_p0, %p106_p11 }
  0x20   :  { %116 = shalt.err (!%p113_p1)
}
  0x21   :  { %33 = dma.hbm_to_vmem [thread:$0]  %s209_s2, 256, %s31_s15, [#allocation7]  }
  0x22   :  { %139 = dma.done.wait [#allocation4], 256  }
  0x23   :  { %140 = vsyncadd [#allocation4], 4294967040 }
  0x24   :  { %141 = dma.done.wait [#allocation7], 256  }
  0x25   :  { %142 = vsyncadd [#allocation7], 4294967040  ;;  %v40_v0 = vld [vmem:[#allocation3] sm:$0xff]  ;;  %v42_v1 = vld [vmem:[#allocation6] sm:$0xff]  ;;  %v47_v2 = vstv %s207_s0  ;;  %s147_s10 = smov [#allocation8]  }
  0x26   :  { %v41_v3 = vld [vmem:[#allocation3 + $0x8] sm:$0xff]  ;;  %v45_v4 = vsub.f32 %v40_v0, %v42_v1  ;;  %v43_v5 = vld [vmem:[#allocation6 + $0x8] sm:$0xff]  ;;  %s60_s11 = sshll.u32 %s147_s10, 4  ;;  %s61_s11 = int_to_ptr.vmem [resolvable:$true] %s60_s11 }
  0x27   :  { %v46_v6 = vsub.f32 %v41_v3, %v43_v5  ;;  %s117_s2 = scalar_lea.vmem %s61_s11, 256  ;;  %p122_p3 = scmp.lt.s32.totalorder %s61_s11, %s61_s11 }
  0x28   :  { %v48_v7 = vmul.f32 %v47_v2, %v45_v4  ;;  %p118_p2 = scmp.ne.s32.totalorder %s61_s11, %s117_s2  ;;  %p123_p4 = scmp.lt.s32.totalorder %s117_s2, %s117_s2 }
  0x29   :  { %v49_v8 = vmul.f32 %v47_v2, %v46_v6 }
  0x2a   :  { %v50_v9 = vadd.f32 %v48_v7, %v42_v1  ;;  %p124_p5 = por %p123_p4, %p122_p3 }
  0x2b   :  { %v51_v10 = vadd.f32 %v49_v8, %v43_v5 }
  0x2c   :  { %52 = vst [vmem:[#allocation8] sm:$0xff] %v50_v9  ;;  %p125_p6 = pnand %p124_p5, %p118_p2 }
  0x2d   :  { %53 = vst [vmem:[#allocation8 + $0x8] sm:$0xff] %v51_v10 }
  0x2e   :  { %128 = shalt.err (!%p125_p6)
}
  0x2f   :  { %s129_s13 = scalar_lea.hbm %s210_s3, 256 }
  0x30   :  { %p130_p7 = scmp.ne.s32.totalorder %s210_s3, %s129_s13  ;;  %p133_p8 = scmp.lt.u32.totalorder %s129_s13, %s210_s3 }
  0x32   :  { %p135_p9 = pnand %p133_p8, %p130_p7 }
  0x34   :  { %138 = shalt.err (!%p135_p9)
}
  0x35   :  { %63 = dma.vmem_to_hbm [thread:$0]  %s61_s11, 256, %s210_s3, [#allocation5]  }
  0x36   :  { %143 = dma.done.wait [#allocation5], 256  }
  0x37   :  { %144 = vsyncadd [#allocation5], 4294967040 }
  0x38   :  { %67 = vsyncpa [#allocation4], 1 }
  0x39   :  { %68 = vsyncpa [#allocation7], 1 }
  0x3a   :  { %69 = vsyncpa [#allocation5], 1 }

</bundles_post_ra>
